<compile_context>
chip_gen: v6e
topology: v6e:2x2x1
jax: 0.10.0
libtpu: 0.0.40
codegen_flags: <defaults>
</compile_context>

<pallas_src>
import jax
import jax.numpy as jnp
from jax.experimental import pallas as pl
from jax.experimental.pallas import tpu as pltpu


def _round_up(x, m):
    return ((x + m - 1) // m) * m


def _cdiv(a, b):
    return -(-a // b)


def _pad2(a, rows, cols):
    r, c = a.shape
    return jnp.pad(a, ((0, rows - r), (0, cols - c)))


_HAS_BUFFERED = hasattr(pl, "Buffered")


def _spec(shape, index_map, buffers):
    """BlockSpec with an explicit buffer count (falls back if unsupported)."""
    if buffers is not None and _HAS_BUFFERED:
        try:
            return pl.BlockSpec(shape, index_map, pipeline_mode=pl.Buffered(buffers))
        except TypeError:
            pass
    return pl.BlockSpec(shape, index_map)


def gru_cell_kernel(x1_ref, x2_ref, wx1_ref, wx2_ref, wo2_ref, b_ref, out_ref):
    Dp = out_ref.shape[-1]          # padded feature dim (multiple of 128)
    mm_dtype = wx1_ref.dtype        # matmul operand dtype (bf16 or f32)

    x1 = x1_ref[...].astype(jnp.float32)   # (TB, Dp) f32 — feeds the final blend
    x2_m = x2_ref[...]                      # (TB, Dp) already in mm_dtype (transport)
    x1_m = x1.astype(mm_dtype)

    # Fused pre-activations of all three gates from x1 (+ fused bias): (TB, 3*Dp)
    a = jnp.dot(x1_m, wx1_ref[...], preferred_element_type=jnp.float32) + b_ref[...]
    # Fused r/z contributions from x2: (TB, 2*Dp)
    brz = jnp.dot(x2_m, wx2_ref[...], preferred_element_type=jnp.float32)

    # Lane slices are 128-aligned because Dp % 128 == 0.
    r = jax.nn.sigmoid(a[:, :Dp] + brz[:, :Dp])
    z = jax.nn.sigmoid(a[:, Dp:2 * Dp] + brz[:, Dp:])

    # r * x2 directly in the matmul dtype (one downcast of r; x2 already mm_dtype).
    rx2 = r.astype(mm_dtype) * x2_m
    o = jnp.tanh(a[:, 2 * Dp:]
                 + jnp.dot(rx2, wo2_ref[...], preferred_element_type=jnp.float32))

    # (1 - z) * x1 + z * o  ==  x1 + z * (o - x1)
    out_ref[...] = (x1 + z * (o - x1)).astype(out_ref.dtype)


def prepare_gru_weights(params, *, matmul_dtype=jnp.bfloat16):
    """Fuse + zero-pad weights once (hoist out of per-step / per-call path).

    params: dict with wr, br, wz, bz, wo, bo.
      wr/wz/wo: (2D, D) float32 (nn.Linear.weight.T);  br/bz/bo: (1, D) float32.
    """
    wr, wz, wo = params["wr"], params["wz"], params["wo"]
    br, bz, bo = params["br"], params["bz"], params["bo"]
    D = wr.shape[1]
    Dp = _round_up(D, 128)

    w_x1 = jnp.concatenate(
        [_pad2(wr[:D], Dp, Dp), _pad2(wz[:D], Dp, Dp), _pad2(wo[:D], Dp, Dp)],
        axis=1).astype(matmul_dtype)                                  # (Dp, 3*Dp)
    w_x2 = jnp.concatenate(
        [_pad2(wr[D:], Dp, Dp), _pad2(wz[D:], Dp, Dp)],
        axis=1).astype(matmul_dtype)                                  # (Dp, 2*Dp)
    w_o2 = _pad2(wo[D:], Dp, Dp).astype(matmul_dtype)                 # (Dp, Dp)
    b_all = jnp.concatenate(
        [_pad2(br.reshape(1, D), 1, Dp),
         _pad2(bz.reshape(1, D), 1, Dp),
         _pad2(bo.reshape(1, D), 1, Dp)],
        axis=1).astype(jnp.float32)                                   # (1, 3*Dp)
    return dict(w_x1=w_x1, w_x2=w_x2, w_o2=w_o2, b_all=b_all,
                D=D, Dp=Dp, matmul_dtype=matmul_dtype)


def gru_cell_prepared(x1, x2, prep, *, block_b=256, act_buffers=2):
    """Run the GRU cell with already-prepared (fused/padded) weights.

    block_b: target batch-tile size.  v6e can use 512-1024; keep <=256-512 on
    v7x (half the VMEM) and the default 256 on v5e.
    act_buffers: buffer depth for x1/x2/out tiles (raise to 3 on v5e if DMA is
    exposed); weights/bias are always single-buffered.
    """
    B, D = x1.shape
    assert D == prep["D"], "feature dim mismatch with prepared weights"
    Dp = prep["Dp"]
    mm_dtype = prep["matmul_dtype"]

    # Divisor-style batch tiling: caps padding at < 8 rows per tile.
    nb = max(1, _cdiv(B, block_b))
    tb = _round_up(_cdiv(B, nb), 8)
    # Give the "parallel" grid axis >= 2 steps when possible (v7x has 2 TCs).
    if nb == 1 and tb >= 16:
        nb = 2
        tb = _round_up(_cdiv(B, nb), 8)
    Bp = nb * tb

    # x1 stays f32 (feeds the blend); x2 is transported in the matmul dtype.
    x1p = _pad2(x1.astype(jnp.float32), Bp, Dp)
    x2p = _pad2(x2.astype(mm_dtype), Bp, Dp)

    # --- VMEM budget: single-buffered weights + N-buffered activations + temps.
    w_itms = jnp.dtype(mm_dtype).itemsize
    weights_bytes = 6 * Dp * Dp * w_itms              # W_x1 + W_x2 + W_o2, 1 buffer
    bias_bytes = 3 * Dp * 4
    act_bytes = act_buffers * tb * Dp * (4 + w_itms + 4)   # x1(f32) + x2(mm) + out(f32)
    interm_bytes = 10 * tb * Dp * 4                   # a, brz, r, z, rx2, o, blend
    vmem_needed = weights_bytes + bias_bytes + act_bytes + interm_bytes
    vmem_limit = min(100 * 1024 * 1024,
                     max(32 * 1024 * 1024, int(1.3 * vmem_needed)))

    cost = pl.CostEstimate(
        flops=12 * Bp * Dp * Dp,                      # 2*B*Dp*(3Dp+2Dp+Dp)
        transcendentals=3 * Bp * Dp,                  # 2x sigmoid + 1x tanh
        bytes_accessed=Bp * Dp * (4 + w_itms + 4) + weights_bytes + bias_bytes,
    )

    out = pl.pallas_call(
        gru_cell_kernel,
        out_shape=jax.ShapeDtypeStruct((Bp, Dp), x1.dtype),
        grid_spec=pltpu.PrefetchScalarGridSpec(
            num_scalar_prefetch=0,
            grid=(nb,),
            in_specs=[
                _spec((tb, Dp), lambda i: (i, 0), act_buffers),        # x1 tile
                _spec((tb, Dp), lambda i: (i, 0), act_buffers),        # x2 tile
                _spec((Dp, 3 * Dp), lambda i: (0, 0), 1),              # W_x1 (resident)
                _spec((Dp, 2 * Dp), lambda i: (0, 0), 1),              # W_x2 (resident)
                _spec((Dp, Dp), lambda i: (0, 0), 1),                  # W_o2 (resident)
                _spec((1, 3 * Dp), lambda i: (0, 0), 1),               # fused bias
            ],
            out_specs=_spec((tb, Dp), lambda i: (i, 0), act_buffers),
        ),
        compiler_params=pltpu.CompilerParams(
            dimension_semantics=("parallel",),        # shard batch tiles across TCs
            vmem_limit_bytes=vmem_limit,
        ),
        cost_estimate=cost,
    )(x1p, x2p, prep["w_x1"], prep["w_x2"], prep["w_o2"], prep["b_all"])

    return out[:B, :D].astype(x1.dtype)


def gru_cell(x1, x2, params, *, block_b=256, matmul_dtype=jnp.bfloat16,
             act_buffers=2):
    """Convenience wrapper.  For RNN loops, call prepare_gru_weights() once and
    use gru_cell_prepared() per step instead."""
    prep = prepare_gru_weights(params, matmul_dtype=matmul_dtype)
    return gru_cell_prepared(x1, x2, prep, block_b=block_b,
                             act_buffers=act_buffers)


def init_params(key, input_dim):
    """Deterministic synthetic init (uniform, like init='uniform' in the module)."""
    # TODO(synk): init_weight() in the original repo is external; approximated
    # with uniform(-1/sqrt(fan_in), 1/sqrt(fan_in)) here.
    D = input_dim
    keys = jax.random.split(key, 6)
    scale = 1.0 / jnp.sqrt(2.0 * D)
    # Weights stored as (2D, D) == nn.Linear.weight.T
    wr = jax.random.uniform(keys[0], (2 * D, D), jnp.float32, -scale, scale)
    wz = jax.random.uniform(keys[1], (2 * D, D), jnp.float32, -scale, scale)
    wo = jax.random.uniform(keys[2], (2 * D, D), jnp.float32, -scale, scale)
    br = jax.random.uniform(keys[3], (1, D), jnp.float32, -scale, scale)
    bz = jax.random.uniform(keys[4], (1, D), jnp.float32, -scale, scale)
    bo = jax.random.uniform(keys[5], (1, D), jnp.float32, -scale, scale)
    return dict(wr=wr, br=br, wz=wz, bz=bz, wo=wo, bo=bo)


def gru_cell_ref(x1, x2, p):
    """Pure-JAX reference mirroring the PyTorch forward."""
    x = jnp.concatenate([x1, x2], axis=-1)
    r = jax.nn.sigmoid(x @ p["wr"] + p["br"])
    z = jax.nn.sigmoid(x @ p["wz"] + p["bz"])
    xo = jnp.concatenate([x1, r * x2], axis=-1)
    o = jnp.tanh(xo @ p["wo"] + p["bo"])
    return (1.0 - z) * x1 + z * o


if __name__ == "__main__":
    B, D = 8, 32   # batch=8, input_dim=32
    key = jax.random.PRNGKey(0)
    k1, k2, kp = jax.random.split(key, 3)
    x1 = jax.random.normal(k1, (B, D), jnp.float32)
    x2 = jax.random.normal(k2, (B, D), jnp.float32)
    params = init_params(kp, D)

    ref = gru_cell_ref(x1, x2, params)

    # Weight prep hoisted: done once per dtype, reused across calls.
    prep_f32 = prepare_gru_weights(params, matmul_dtype=jnp.float32)
    prep_bf16 = prepare_gru_weights(params, matmul_dtype=jnp.bfloat16)

    # f32-matmul path: exact check of the fused / padded decomposition.
    out_f32 = jax.block_until_ready(gru_cell_prepared(x1, x2, prep_f32))
    assert out_f32.shape == (B, D)
    assert jnp.allclose(out_f32, ref, atol=1e-5, rtol=1e-5)

    # Default bf16-matmul + bf16 x2-transport path (MXU / HBM friendly).
    out_bf16 = jax.block_until_ready(gru_cell_prepared(x1, x2, prep_bf16))
    assert out_bf16.shape == (B, D)
    assert jnp.allclose(out_bf16, ref, atol=5e-2, rtol=5e-2)

    # Exercise divisor-style padding + the >=2-tile split (B=20, single tile
    # would otherwise cover it; kernel splits it into 2 tiles of 16).
    B2 = 20
    k3, k4 = jax.random.split(k1)
    y1 = jax.random.normal(k3, (B2, D), jnp.float32)
    y2 = jax.random.normal(k4, (B2, D), jnp.float32)
    ref2 = gru_cell_ref(y1, y2, params)
    out2 = jax.block_until_ready(gru_cell_prepared(y1, y2, prep_f32))
    assert out2.shape == (B2, D)
    assert jnp.allclose(out2, ref2, atol=1e-5, rtol=1e-5)

    # Multi-tile grid path (3 tiles of 8) with deeper activation buffering.
    out3 = jax.block_until_ready(
        gru_cell_prepared(y1, y2, prep_f32, block_b=8, act_buffers=3))
    assert jnp.allclose(out3, ref2, atol=1e-5, rtol=1e-5)

    print("KERNEL_OK")
</pallas_src>

<mosaic_0001>
module attributes {stable_mosaic.version = 11 : i64} {
  func.func @gru_cell_kernel(%arg0: i32, %arg1: memref<8x128xf32, #tpu.memory_space<vmem>>, %arg2: memref<8x128xf32, #tpu.memory_space<vmem>>, %arg3: memref<128x384xf32, #tpu.memory_space<vmem>>, %arg4: memref<128x256xf32, #tpu.memory_space<vmem>>, %arg5: memref<128x128xf32, #tpu.memory_space<vmem>>, %arg6: memref<1x384xf32, #tpu.memory_space<vmem>>, %arg7: memref<8x128xf32, #tpu.memory_space<vmem>>) attributes {dimension_semantics = [#tpu.dimension_semantics<parallel>], iteration_bounds = array<i64: 1>, scalar_prefetch = 0 : i64, scratch_operands = 0 : i64, tpu.core_type = #tpu.core_type<tc>, window_params = [{pipeline_mode = #tpu.pipeline_mode<double_buffered>, transform_indices = @transform_0, window_bounds = array<i64: 8, 128>}, {pipeline_mode = #tpu.pipeline_mode<double_buffered>, transform_indices = @transform_1, window_bounds = array<i64: 8, 128>}, {pipeline_mode = #tpu.pipeline_mode<synchronous>, transform_indices = @transform_2, window_bounds = array<i64: 128, 384>}, {pipeline_mode = #tpu.pipeline_mode<synchronous>, transform_indices = @transform_3, window_bounds = array<i64: 128, 256>}, {pipeline_mode = #tpu.pipeline_mode<synchronous>, transform_indices = @transform_4, window_bounds = array<i64: 128, 128>}, {pipeline_mode = #tpu.pipeline_mode<synchronous>, transform_indices = @transform_5, window_bounds = array<i64: 1, 384>}, {pipeline_mode = #tpu.pipeline_mode<double_buffered>, transform_indices = @transform_6, window_bounds = array<i64: 8, 128>}]} {
    %c0 = arith.constant 0 : index
    %c0_0 = arith.constant 0 : index
    %0 = vector.load %arg1[%c0, %c0_0] : memref<8x128xf32, #tpu.memory_space<vmem>>, vector<8x128xf32>
    %c0_1 = arith.constant 0 : index
    %c0_2 = arith.constant 0 : index
    %1 = vector.load %arg2[%c0_1, %c0_2] : memref<8x128xf32, #tpu.memory_space<vmem>>, vector<8x128xf32>
    %c0_3 = arith.constant 0 : index
    %c0_4 = arith.constant 0 : index
    %2 = vector.load %arg3[%c0_3, %c0_4] : memref<128x384xf32, #tpu.memory_space<vmem>>, vector<128x384xf32>
    %cst = arith.constant dense<0.000000e+00> : vector<8x384xf32>
    %3 = tpu.matmul %0, %2, %cst {dimension_numbers = #tpu.dot_dimension_numbers<[1], [0], [0], [1], [0, 0, 1, 1], [], []>} : vector<8x128xf32>, vector<128x384xf32>, vector<8x384xf32> -> vector<8x384xf32>
    %c0_5 = arith.constant 0 : index
    %c0_6 = arith.constant 0 : index
    %4 = vector.load %arg6[%c0_5, %c0_6] : memref<1x384xf32, #tpu.memory_space<vmem>>, vector<1x384xf32>
    %5 = vector.broadcast %4 : vector<1x384xf32> to vector<8x384xf32>
    %6 = arith.addf %3, %5 : vector<8x384xf32>
    %c0_7 = arith.constant 0 : index
    %c0_8 = arith.constant 0 : index
    %7 = vector.load %arg4[%c0_7, %c0_8] : memref<128x256xf32, #tpu.memory_space<vmem>>, vector<128x256xf32>
    %cst_9 = arith.constant dense<0.000000e+00> : vector<8x256xf32>
    %8 = tpu.matmul %1, %7, %cst_9 {dimension_numbers = #tpu.dot_dimension_numbers<[1], [0], [0], [1], [0, 0, 1, 1], [], []>} : vector<8x128xf32>, vector<128x256xf32>, vector<8x256xf32> -> vector<8x256xf32>
    %9 = vector.extract_strided_slice %6 {offsets = [0, 0], sizes = [8, 128], strides = [1, 1]} : vector<8x384xf32> to vector<8x128xf32>
    %10 = vector.extract_strided_slice %8 {offsets = [0, 0], sizes = [8, 128], strides = [1, 1]} : vector<8x256xf32> to vector<8x128xf32>
    %11 = arith.addf %9, %10 : vector<8x128xf32>
    %12 = arith.negf %11 : vector<8x128xf32>
    %13 = math.exp %12 : vector<8x128xf32>
    %cst_10 = arith.constant 1.000000e+00 : f32
    %14 = vector.broadcast %cst_10 : f32 to vector<8x128xf32>
    %15 = arith.addf %14, %13 : vector<8x128xf32>
    %16 = arith.divf %14, %15 : vector<8x128xf32>
    %17 = vector.extract_strided_slice %6 {offsets = [0, 128], sizes = [8, 128], strides = [1, 1]} : vector<8x384xf32> to vector<8x128xf32>
    %18 = vector.extract_strided_slice %8 {offsets = [0, 128], sizes = [8, 128], strides = [1, 1]} : vector<8x256xf32> to vector<8x128xf32>
    %19 = arith.addf %17, %18 : vector<8x128xf32>
    %20 = arith.negf %19 : vector<8x128xf32>
    %21 = math.exp %20 : vector<8x128xf32>
    %cst_11 = arith.constant 1.000000e+00 : f32
    %22 = vector.broadcast %cst_11 : f32 to vector<8x128xf32>
    %23 = arith.addf %22, %21 : vector<8x128xf32>
    %24 = arith.divf %22, %23 : vector<8x128xf32>
    %25 = arith.mulf %16, %1 : vector<8x128xf32>
    %26 = vector.extract_strided_slice %6 {offsets = [0, 256], sizes = [8, 128], strides = [1, 1]} : vector<8x384xf32> to vector<8x128xf32>
    %c0_12 = arith.constant 0 : index
    %c0_13 = arith.constant 0 : index
    %27 = vector.load %arg5[%c0_12, %c0_13] : memref<128x128xf32, #tpu.memory_space<vmem>>, vector<128x128xf32>
    %cst_14 = arith.constant dense<0.000000e+00> : vector<8x128xf32>
    %28 = tpu.matmul %25, %27, %cst_14 {dimension_numbers = #tpu.dot_dimension_numbers<[1], [0], [0], [1], [0, 0, 1, 1], [], []>} : vector<8x128xf32>, vector<128x128xf32>, vector<8x128xf32> -> vector<8x128xf32>
    %29 = arith.addf %26, %28 : vector<8x128xf32>
    %30 = math.tanh %29 : vector<8x128xf32>
    %31 = arith.subf %30, %0 : vector<8x128xf32>
    %32 = arith.mulf %24, %31 : vector<8x128xf32>
    %33 = arith.addf %0, %32 : vector<8x128xf32>
    %c0_15 = arith.constant 0 : index
    %c0_16 = arith.constant 0 : index
    %34 = vector.load %arg7[%c0_15, %c0_16] : memref<8x128xf32, #tpu.memory_space<vmem>>, vector<8x128xf32>
    tpu.vector_store %arg7[%c0_15, %c0_16], %33 {strides = array<i32>} : memref<8x128xf32, #tpu.memory_space<vmem>>, vector<8x128xf32>,
    return
  }
  func.func @transform_0(%arg0: i32) -> (i32, i32) {
    %c0_i32 = arith.constant 0 : i32
    %c0_i32_0 = arith.constant 0 : i32
    return %arg0, %c0_i32 : i32, i32
  }
  func.func @transform_1(%arg0: i32) -> (i32, i32) {
    %c0_i32 = arith.constant 0 : i32
    %c0_i32_0 = arith.constant 0 : i32
    return %arg0, %c0_i32 : i32, i32
  }
  func.func @transform_2(%arg0: i32) -> (i32, i32) {
    %c0_i32 = arith.constant 0 : i32
    %c0_i32_0 = arith.constant 0 : i32
    %c0_i32_1 = arith.constant 0 : i32
    return %c0_i32, %c0_i32_0 : i32, i32
  }
  func.func @transform_3(%arg0: i32) -> (i32, i32) {
    %c0_i32 = arith.constant 0 : i32
    %c0_i32_0 = arith.constant 0 : i32
    %c0_i32_1 = arith.constant 0 : i32
    return %c0_i32, %c0_i32_0 : i32, i32
  }
  func.func @transform_4(%arg0: i32) -> (i32, i32) {
    %c0_i32 = arith.constant 0 : i32
    %c0_i32_0 = arith.constant 0 : i32
    %c0_i32_1 = arith.constant 0 : i32
    return %c0_i32, %c0_i32_0 : i32, i32
  }
  func.func @transform_5(%arg0: i32) -> (i32, i32) {
    %c0_i32 = arith.constant 0 : i32
    %c0_i32_0 = arith.constant 0 : i32
    %c0_i32_1 = arith.constant 0 : i32
    return %c0_i32, %c0_i32_0 : i32, i32
  }
  func.func @transform_6(%arg0: i32) -> (i32, i32) {
    %c0_i32 = arith.constant 0 : i32
    %c0_i32_0 = arith.constant 0 : i32
    return %arg0, %c0_i32 : i32, i32
  }
}

</mosaic_0001>

<bundles_post_ra>
// kernel: tpu_custom_call.1
= control target key start
LH: loop header
LB: loop body
LE: loop exit
PB: predicated region body
PF: predicated region fallthrough
CT: control target
= control target key end

     0   :  { %11 = vsyncpa [#allocation3], 0  ;;  %s897_s0 = inlined_call_operand.hbm [shape: f32[8,128], index: 0, kind: input, shape index: {}]   ;;  %s898_s1 = inlined_call_operand.hbm [shape: f32[8,128], index: 1, kind: input, shape index: {}]   ;;  %s899_s2 = inlined_call_operand.hbm [shape: f32[128,384], index: 2, kind: input, shape index: {}]   ;;  %s900_s3 = inlined_call_operand.hbm [shape: f32[128,256], index: 3, kind: input, shape index: {}]   ;;  %s901_s4 = inlined_call_operand.hbm [shape: f32[128,128], index: 4, kind: input, shape index: {}]   ;;  %s902_s5 = inlined_call_operand.vmem [shape: f32[1,384], index: 5, kind: input, shape index: {}]   ;;  %s903_s6 = inlined_call_operand.hbm [shape: f32[8,128], index: 6, kind: output, shape index: {}]  }
   0x1   :  { %12 = vsyncpa [#allocation6], 0 }
   0x2   :  { %13 = vsyncpa [#allocation9], 0 }
   0x3   :  { %14 = vsyncpa [#allocation4], 0  ;;  %s781_s21 = smov [#allocation5]   ;;  %s782_s23 = smov [#allocation8]  }
   0x4   :  { %s31_s22 = sshll.u32 %s781_s21, 4  ;;  %s52_s24 = sshll.u32 %s782_s23, 4  ;;  %s32_s22 = int_to_ptr.vmem [resolvable:$true] %s31_s22  ;;  %s53_s24 = int_to_ptr.vmem [resolvable:$true] %s52_s24 }
   0x5   :  { %s661_s25 = scalar_lea.vmem %s32_s22, 128  ;;  %p666_p1 = scmp.lt.s32.totalorder %s32_s22, %s32_s22 }
   0x6   :  { %p662_p0 = scmp.ne.s32.totalorder %s32_s22, %s661_s25  ;;  %p667_p2 = scmp.lt.s32.totalorder %s661_s25, %s661_s25 }
   0x8   :  { %p668_p3 = por %p667_p2, %p666_p1 }
   0xa   :  { %p669_p4 = pnand %p668_p3, %p662_p0 }
   0xc   :  { %672 = shalt.err (!%p669_p4)
}
   0xd   :  { %34 = dma.hbm_to_vmem [thread:$0]  %s898_s1, 128, %s32_s22, [#allocation6]  }
   0xe   :  { %s681_s28 = scalar_lea.vmem %s53_s24, 4096  ;;  %p686_p6 = scmp.lt.s32.totalorder %s53_s24, %s53_s24 }
   0xf   :  { %p682_p5 = scmp.ne.s32.totalorder %s53_s24, %s681_s28  ;;  %p687_p7 = scmp.lt.s32.totalorder %s681_s28, %s681_s28 }
  0x11   :  { %p688_p8 = por %p687_p7, %p686_p6 }
  0x13   :  { %p689_p9 = pnand %p688_p8, %p682_p5 }
  0x15   :  { %692 = shalt.err (!%p689_p9)
}
  0x16   :  { %s783_s29 = smov 256   ;;  %s784_s30 = smov 16  }
  0x17   :  { %58 = dma.hbm_to_vmem [thread:$0]  %s900_s3, 4096, %s53_s24, [#allocation9], %s783_s29, %s783_s29, %s784_s30  }
  0x18   :  { %s785_s9 = smov [#allocation2]   ;;  %s786_s11 = smov [#allocation7]  }
  0x19   :  { %s21_s10 = sshll.u32 %s785_s9, 4  ;;  %s40_s12 = sshll.u32 %s786_s11, 4  ;;  %s22_s10 = int_to_ptr.vmem [resolvable:$true] %s21_s10  ;;  %s41_s12 = int_to_ptr.vmem [resolvable:$true] %s40_s12 }
  0x1a   :  { %s701_s1 = scalar_lea.vmem %s22_s10, 128  ;;  %p706_p11 = scmp.lt.s32.totalorder %s22_s10, %s22_s10 }
  0x1b   :  { %p702_p10 = scmp.ne.s32.totalorder %s22_s10, %s701_s1  ;;  %p707_p12 = scmp.lt.s32.totalorder %s701_s1, %s701_s1 }
  0x1d   :  { %p708_p13 = por %p707_p12, %p706_p11 }
  0x1f   :  { %p709_p0 = pnand %p708_p13, %p702_p10 }
  0x21   :  { %712 = shalt.err (!%p709_p0)
}
  0x22   :  { %24 = dma.hbm_to_vmem [thread:$0]  %s897_s0, 128, %s22_s10, [#allocation3]  }
  0x23   :  { %s721_s15 = scalar_lea.vmem %s41_s12, 6144  ;;  %p726_p2 = scmp.lt.s32.totalorder %s41_s12, %s41_s12 }
  0x24   :  { %p722_p1 = scmp.ne.s32.totalorder %s41_s12, %s721_s15  ;;  %p727_p3 = scmp.lt.s32.totalorder %s721_s15, %s721_s15 }
  0x26   :  { %p728_p4 = por %p727_p3, %p726_p2 }
  0x28   :  { %p729_p5 = pnand %p728_p4, %p722_p1 }
  0x2a   :  { %732 = shalt.err (!%p729_p5)
}
  0x2b   :  { %s787_s3 = smov 384   ;;  %s788_s16 = smov 24  }
  0x2c   :  { %46 = dma.hbm_to_vmem [thread:$0]  %s899_s2, 6144, %s41_s12, [#allocation6], %s787_s3, %s787_s3, %s788_s16  }
  0x2d   :  { %s789_s19 = smov [#allocation10]  }
  0x2e   :  { %s64_s20 = sshll.u32 %s789_s19, 4  ;;  %s65_s20 = int_to_ptr.vmem [resolvable:$true] %s64_s20 }
  0x2f   :  { %s741_s21 = scalar_lea.vmem %s65_s20, 2048  ;;  %p746_p7 = scmp.lt.s32.totalorder %s65_s20, %s65_s20 }
  0x30   :  { %p742_p6 = scmp.ne.s32.totalorder %s65_s20, %s741_s21  ;;  %p747_p8 = scmp.lt.s32.totalorder %s741_s21, %s741_s21 }
  0x32   :  { %p748_p9 = por %p747_p8, %p746_p7 }
  0x34   :  { %p749_p10 = pnand %p748_p9, %p742_p6 }
  0x36   :  { %752 = shalt.err (!%p749_p10)
}
  0x37   :  { %s790_s0 = smov 128   ;;  %s791_s22 = smov 8  }
  0x38   :  { %70 = dma.hbm_to_vmem [thread:$0]  %s901_s4, 2048, %s65_s20, [#allocation9], %s790_s0, %s790_s0, %s791_s22  }
  0x39   :  { %773 = dma.done.wait [#allocation3], 128  }
  0x3a   :  { %774 = vsyncadd [#allocation3], 4294967168 }
  0x3b   :  { %775 = dma.done.wait [#allocation6], 6272  }
  0x3c   :  { %776 = vsyncadd [#allocation6], 4294961024 }
  0x3d   :  { %777 = dma.done.wait [#allocation9], 6144  }
  0x3e   :  { %778 = vsyncadd [#allocation9], 4294961152  ;;  %v792_v0 = vmov 0.0   ;;  %v136_v1 = vld [vmem:[#allocation7 + $0x170] sm:$0xff]  ;;  %v135_v2 = vld [vmem:[#allocation7 + $0x168] sm:$0xff]  ;;  %vm793_vm0 = vmmov 0  }
  0x3f   :  { %219 = vmatprep.mubr.f32.mxu0 %v792_v0  ;;  %559 = vmatprep.subr.mxu1 %v792_v0  ;;  %v133_v3 = vld [vmem:[#allocation7 + $0x158] sm:$0xff]  ;;  %v132_v4 = vld [vmem:[#allocation7 + $0x150] sm:$0xff]  ;;  %v130_v5 = vld [vmem:[#allocation7 + $0x140] sm:$0xff] }
  0x40   :  { %155 = vmatprep.subr.mxu0 %v136_v1  ;;  %v129_v6 = vld [vmem:[#allocation7 + $0x138] sm:$0xff]  ;;  %v127_v7 = vld [vmem:[#allocation7 + $0x128] sm:$0xff]  ;;  %v126_v8 = vld [vmem:[#allocation7 + $0x120] sm:$0xff]  ;;  %591 = vmatprep.mubr.msk.f32.mxu1 %vm793_vm0, %v792_v0 }
  0x41   :  { %156 = vmatpush1.msra.mxu0 %v135_v2  ;;  %v124_v9 = vld [vmem:[#allocation7 + $0x110] sm:$0xff]  ;;  %v123_v10 = vld [vmem:[#allocation7 + $0x108] sm:$0xff]  ;;  %v121_v11 = vld [vmem:[#allocation7 + $0xf8] sm:$0xff] }
  0x42   :  { %157 = vmatprep.subr.mxu0 %v133_v3  ;;  %v120_v12 = vld [vmem:[#allocation7 + $0xf0] sm:$0xff]  ;;  %v118_v13 = vld [vmem:[#allocation7 + $0xe0] sm:$0xff]  ;;  %v117_v14 = vld [vmem:[#allocation7 + $0xd8] sm:$0xff] }
  0x43   :  { %158 = vmatpush1.msra.mxu0 %v132_v4  ;;  %v115_v15 = vld [vmem:[#allocation7 + $0xc8] sm:$0xff]  ;;  %v114_v16 = vld [vmem:[#allocation7 + $0xc0] sm:$0xff]  ;;  %v112_v17 = vld [vmem:[#allocation7 + $0xb0] sm:$0xff] }
  0x44   :  { %159 = vmatprep.subr.mxu0 %v130_v5  ;;  %v111_v18 = vld [vmem:[#allocation7 + $0xa8] sm:$0xff]  ;;  %v109_v19 = vld [vmem:[#allocation7 + $0x98] sm:$0xff]  ;;  %v108_v20 = vld [vmem:[#allocation7 + $0x90] sm:$0xff] }
  0x45   :  { %160 = vmatpush1.msra.mxu0 %v129_v6  ;;  %v106_v21 = vld [vmem:[#allocation7 + $0x80] sm:$0xff]  ;;  %v105_v22 = vld [vmem:[#allocation7 + $0x78] sm:$0xff]  ;;  %v103_v23 = vld [vmem:[#allocation7 + $0x68] sm:$0xff] }
  0x46   :  { %161 = vmatprep.subr.mxu0 %v127_v7  ;;  %v102_v24 = vld [vmem:[#allocation7 + $0x60] sm:$0xff]  ;;  %v100_v25 = vld [vmem:[#allocation7 + $0x50] sm:$0xff]  ;;  %v99_v26 = vld [vmem:[#allocation7 + $0x48] sm:$0xff] }
  0x47   :  { %162 = vmatpush1.msra.mxu0 %v126_v8  ;;  %v97_v27 = vld [vmem:[#allocation7 + $0x38] sm:$0xff]  ;;  %v96_v28 = vld [vmem:[#allocation7 + $0x30] sm:$0xff]  ;;  %v94_v29 = vld [vmem:[#allocation7 + $0x20] sm:$0xff] }
  0x48   :  { %163 = vmatprep.subr.mxu0 %v124_v9  ;;  %v93_v30 = vld [vmem:[#allocation7 + $0x18] sm:$0xff]  ;;  %v91_v31 = vld [vmem:[#allocation7 + $0x8] sm:$0xff]  ;;  %v90_v32 = vld [vmem:[#allocation7] sm:$0xff] }
  0x49   :  { %164 = vmatpush1.msra.mxu0 %v123_v10  ;;  %v847_v33 = vld [vmem:[#allocation2] sm:$0xff]  ;;  %v327_v34 = vld [vmem:[#allocation8 + $0xf8] sm:$0xff]  ;;  %v325_v36 = vld [vmem:[#allocation8 + $0xe8] sm:$0xff] }
  0x4a   :  { %165 = vmatprep.subr.mxu0 %v121_v11  ;;  %v326_v35 = vld [vmem:[#allocation8 + $0xf0] sm:$0xff]  ;;  %v324_v37 = vld [vmem:[#allocation8 + $0xe0] sm:$0xff]  ;;  %v323_v38 = vld [vmem:[#allocation8 + $0xd8] sm:$0xff] }
  0x4b   :  { %166 = vmatpush1.msra.mxu0 %v120_v12  ;;  %v322_v39 = vld [vmem:[#allocation8 + $0xd0] sm:$0xff]  ;;  %v321_v40 = vld [vmem:[#allocation8 + $0xc8] sm:$0xff]  ;;  %v320_v41 = vld [vmem:[#allocation8 + $0xc0] sm:$0xff] }
  0x4c   :  { %167 = vmatprep.subr.mxu0 %v118_v13  ;;  %v319_v42 = vld [vmem:[#allocation8 + $0xb8] sm:$0xff]  ;;  %v318_v43 = vld [vmem:[#allocation8 + $0xb0] sm:$0xff]  ;;  %v317_v44 = vld [vmem:[#allocation8 + $0xa8] sm:$0xff] }
  0x4d   :  { %168 = vmatpush1.msra.mxu0 %v117_v14  ;;  %v316_v45 = vld [vmem:[#allocation8 + $0xa0] sm:$0xff]  ;;  %v315_v46 = vld [vmem:[#allocation8 + $0x98] sm:$0xff]  ;;  %v314_v47 = vld [vmem:[#allocation8 + $0x90] sm:$0xff] }
  0x4e   :  { %169 = vmatprep.subr.mxu0 %v115_v15  ;;  %v313_v48 = vld [vmem:[#allocation8 + $0x88] sm:$0xff]  ;;  %v312_v49 = vld [vmem:[#allocation8 + $0x80] sm:$0xff]  ;;  %v311_v50 = vld [vmem:[#allocation8 + $0x78] sm:$0xff] }
  0x4f   :  { %170 = vmatpush1.msra.mxu0 %v114_v16  ;;  %v310_v51 = vld [vmem:[#allocation8 + $0x70] sm:$0xff]  ;;  %v309_v52 = vld [vmem:[#allocation8 + $0x68] sm:$0xff]  ;;  %v308_v53 = vld [vmem:[#allocation8 + $0x60] sm:$0xff] }
  0x50   :  { %171 = vmatprep.subr.mxu0 %v112_v17  ;;  %v307_v54 = vld [vmem:[#allocation8 + $0x58] sm:$0xff]  ;;  %v306_v55 = vld [vmem:[#allocation8 + $0x50] sm:$0xff]  ;;  %v305_v56 = vld [vmem:[#allocation8 + $0x48] sm:$0xff] }
  0x51   :  { %172 = vmatpush1.msra.mxu0 %v111_v18  ;;  %v304_v57 = vld [vmem:[#allocation8 + $0x40] sm:$0xff]  ;;  %v303_v58 = vld [vmem:[#allocation8 + $0x38] sm:$0xff]  ;;  %v302_v59 = vld [vmem:[#allocation8 + $0x30] sm:$0xff] }
  0x52   :  { %173 = vmatprep.subr.mxu0 %v109_v19  ;;  %v301_v60 = vld [vmem:[#allocation8 + $0x28] sm:$0xff]  ;;  %v300_v61 = vld [vmem:[#allocation8 + $0x20] sm:$0xff]  ;;  %v299_v62 = vld [vmem:[#allocation8 + $0x18] sm:$0xff] }
  0x53   :  { %174 = vmatpush1.msra.mxu0 %v108_v20  ;;  %v298_v63 = vld [vmem:[#allocation8 + $0x10] sm:$0xff]  ;;  %v297_v1 = vld [vmem:[#allocation8 + $0x8] sm:$0xff]  ;;  %v296_v2 = vld [vmem:[#allocation8] sm:$0xff] }
  0x54   :  { %175 = vmatprep.subr.mxu0 %v106_v21  ;;  %v851_v3 = vld [vmem:[#allocation5] sm:$0xff]  ;;  %v134_v5 = vld [vmem:[#allocation7 + $0x160] sm:$0xff]  ;;  %v131_v6 = vld [vmem:[#allocation7 + $0x148] sm:$0xff] }
  0x55   :  { %176 = vmatpush1.msra.mxu0 %v105_v22  ;;  %v137_v4 = vld [vmem:[#allocation7 + $0x178] sm:$0xff]  ;;  %v128_v7 = vld [vmem:[#allocation7 + $0x130] sm:$0xff]  ;;  %v122_v9 = vld [vmem:[#allocation7 + $0x100] sm:$0xff] }
  0x56   :  { %177 = vmatprep.subr.mxu0 %v103_v23  ;;  %560 = vmatpush3.msra.mxu1 %v137_v4  ;;  %v125_v8 = vld [vmem:[#allocation7 + $0x118] sm:$0xff]  ;;  %v119_v10 = vld [vmem:[#allocation7 + $0xe8] sm:$0xff]  ;;  %v116_v11 = vld [vmem:[#allocation7 + $0xd0] sm:$0xff] }
  0x57   :  { %178 = vmatpush1.msra.mxu0 %v102_v24  ;;  %561 = vmatprep.subr.mxu1 %v792_v0  ;;  %v113_v12 = vld [vmem:[#allocation7 + $0xb8] sm:$0xff]  ;;  %v110_v13 = vld [vmem:[#allocation7 + $0xa0] sm:$0xff]  ;;  %v107_v14 = vld [vmem:[#allocation7 + $0x88] sm:$0xff] }
  0x58   :  { %179 = vmatprep.subr.mxu0 %v100_v25  ;;  %562 = vmatpush3.msra.mxu1 %v134_v5  ;;  %v104_v15 = vld [vmem:[#allocation7 + $0x70] sm:$0xff]  ;;  %v101_v16 = vld [vmem:[#allocation7 + $0x58] sm:$0xff]  ;;  %v98_v17 = vld [vmem:[#allocation7 + $0x40] sm:$0xff] }
  0x59   :  { %180 = vmatpush1.msra.mxu0 %v99_v26  ;;  %563 = vmatprep.subr.mxu1 %v792_v0  ;;  %v95_v18 = vld [vmem:[#allocation7 + $0x28] sm:$0xff]  ;;  %v92_v19 = vld [vmem:[#allocation7 + $0x10] sm:$0xff]  ;;  %v429_v20 = vld [vmem:[#allocation10 + $0x78] sm:$0xff] }
  0x5a   :  { %181 = vmatprep.subr.mxu0 %v97_v27  ;;  %564 = vmatpush3.msra.mxu1 %v131_v6  ;;  %v428_v21 = vld [vmem:[#allocation10 + $0x70] sm:$0xff]  ;;  %v427_v22 = vld [vmem:[#allocation10 + $0x68] sm:$0xff]  ;;  %v426_v23 = vld [vmem:[#allocation10 + $0x60] sm:$0xff] }
  0x5b   :  { %182 = vmatpush1.msra.mxu0 %v96_v28  ;;  %565 = vmatprep.subr.mxu1 %v792_v0  ;;  %v425_v24 = vld [vmem:[#allocation10 + $0x58] sm:$0xff]  ;;  %v424_v25 = vld [vmem:[#allocation10 + $0x50] sm:$0xff]  ;;  %v423_v26 = vld [vmem:[#allocation10 + $0x48] sm:$0xff] }
  0x5c   :  { %183 = vmatprep.subr.mxu0 %v94_v29  ;;  %566 = vmatpush3.msra.mxu1 %v128_v7  ;;  %v422_v27 = vld [vmem:[#allocation10 + $0x40] sm:$0xff]  ;;  %v421_v28 = vld [vmem:[#allocation10 + $0x38] sm:$0xff]  ;;  %v420_v29 = vld [vmem:[#allocation10 + $0x30] sm:$0xff] }
  0x5d   :  { %184 = vmatpush1.msra.mxu0 %v93_v30  ;;  %567 = vmatprep.subr.mxu1 %v792_v0  ;;  %v419_v30 = vld [vmem:[#allocation10 + $0x28] sm:$0xff] }
  0x5e   :  { %185 = vmatprep.subr.mxu0 %v91_v31  ;;  %568 = vmatpush3.msra.mxu1 %v125_v8  ;;  %v418_v31 = vld [vmem:[#allocation10 + $0x20] sm:$0xff] }
  0x5f   :  { %186 = vmatpush1.msra.mxu0 %v90_v32  ;;  %569 = vmatprep.subr.mxu1 %v792_v0  ;;  %v417_v32 = vld [vmem:[#allocation10 + $0x18] sm:$0xff] }
  0x60   :  { %220 = vmatmul.mubr.f32.vlgmr.msra.gmra.mxu0 %v847_v33  ;;  %328 = vmatprep.subr.mxu0 %v327_v34  ;;  %v416_v34 = vld [vmem:[#allocation10 + $0x10] sm:$0xff] }
  0x61   :  { %329 = vmatpush1.msra.mxu0 %v326_v35  ;;  %392 = vmatprep.mubr.f32.mxu0 %v792_v0  ;;  %v415_v35 = vld [vmem:[#allocation10 + $0x8] sm:$0xff] }
  0x62   :  { %330 = vmatprep.subr.mxu0 %v325_v36  ;;  %570 = vmatpush3.msra.mxu1 %v122_v9  ;;  %v414_v36 = vld [vmem:[#allocation10] sm:$0xff] }
  0x63   :  { %331 = vmatpush1.msra.mxu0 %v324_v37  ;;  %571 = vmatprep.subr.mxu1 %v792_v0  ;;  %v140_v37 = vlaneseq }
  0x64   :  { %332 = vmatprep.subr.mxu0 %v323_v38  ;;  %572 = vmatpush3.msra.mxu1 %v119_v10 }
  0x65   :  { %333 = vmatpush1.msra.mxu0 %v322_v39  ;;  %573 = vmatprep.subr.mxu1 %v792_v0  ;;  %v141_v38 = vshrl.u32 %v140_v37, 7 }
  0x66   :  { %334 = vmatprep.subr.mxu0 %v321_v40  ;;  %574 = vmatpush3.msra.mxu1 %v116_v11  ;;  %v138_v40 = vld [vmem:[%s902_s5] sm:$0x7]  ;;  %s794_s5 = smov [#allocation11]  }
  0x67   :  { %335 = vmatpush1.msra.mxu0 %v320_v41  ;;  %575 = vmatprep.subr.mxu1 %v792_v0  ;;  %v142_v39 = vsub.s32 0, %v141_v38  ;;  %s512_s25 = sshll.u32 %s794_s5, 4  ;;  %s513_s25 = int_to_ptr.vmem [resolvable:$true] %s512_s25 }
  0x68   :  { %336 = vmatprep.subr.mxu0 %v319_v42  ;;  %576 = vmatpush3.msra.mxu1 %v113_v12  ;;  %s753_s26 = scalar_lea.vmem %s513_s25, 128  ;;  %p758_p12 = scmp.lt.s32.totalorder %s513_s25, %s513_s25 }
  0x69   :  { %337 = vmatpush1.msra.mxu0 %v318_v43  ;;  %577 = vmatprep.subr.mxu1 %v792_v0  ;;  %v143_v42 = vrot.slane %v138_v40, %v142_v39  ;;  %p754_p11 = scmp.ne.s32.totalorder %s513_s25, %s753_s26  ;;  %p759_p13 = scmp.lt.s32.totalorder %s753_s26, %s753_s26 }
  0x6a   :  { %338 = vmatprep.subr.mxu0 %v317_v44  ;;  %578 = vmatpush3.msra.mxu1 %v110_v13 }
  0x6b   :  { %339 = vmatpush1.msra.mxu0 %v316_v45  ;;  %579 = vmatprep.subr.mxu1 %v792_v0  ;;  %p760_p0 = por %p759_p13, %p758_p12 }
  0x6c   :  { %340 = vmatprep.subr.mxu0 %v315_v46  ;;  %580 = vmatpush3.msra.mxu1 %v107_v14 }
  0x6d   :  { %341 = vmatpush1.msra.mxu0 %v314_v47  ;;  %581 = vmatprep.subr.mxu1 %v792_v0  ;;  %p761_p1 = pnand %p760_p0, %p754_p11 }
  0x6e   :  { %342 = vmatprep.subr.mxu0 %v313_v48  ;;  %582 = vmatpush3.msra.mxu1 %v104_v15 }
  0x6f   :  { %343 = vmatpush1.msra.mxu0 %v312_v49  ;;  %583 = vmatprep.subr.mxu1 %v792_v0 }
  0x70   :  { %344 = vmatprep.subr.mxu0 %v311_v50  ;;  %584 = vmatpush3.msra.mxu1 %v101_v16 }
  0x71   :  { %345 = vmatpush1.msra.mxu0 %v310_v51  ;;  %585 = vmatprep.subr.mxu1 %v792_v0 }
  0x72   :  { %346 = vmatprep.subr.mxu0 %v309_v52  ;;  %586 = vmatpush3.msra.mxu1 %v98_v17 }
  0x73   :  { %347 = vmatpush1.msra.mxu0 %v308_v53  ;;  %587 = vmatprep.subr.mxu1 %v792_v0  ;;  %v146_v53 = vsub.s32 1, %v141_v38 }
  0x74   :  { %348 = vmatprep.subr.mxu0 %v307_v54  ;;  %588 = vmatpush3.msra.mxu1 %v95_v18 }
  0x75   :  { %349 = vmatpush1.msra.mxu0 %v306_v55  ;;  %589 = vmatprep.subr.mxu1 %v792_v0  ;;  %v147_v54 = vrot.slane %v138_v40, %v146_v53 }
  0x76   :  { %350 = vmatprep.subr.mxu0 %v305_v56  ;;  %590 = vmatpush3.msra.mxu1 %v92_v19 }
  0x77   :  { %351 = vmatpush1.msra.mxu0 %v304_v57  ;;  %592 = vmatmul.mubr.f32.vlgmr.msra.gmra.mxu1 %v847_v33 }
  0x78   :  { %352 = vmatprep.subr.mxu0 %v303_v58  ;;  %594 = vmatprep.subr.mxu1 %v792_v0 }
  0x79   :  { %353 = vmatpush1.msra.mxu0 %v302_v59  ;;  %626 = vmatprep.mubr.msk.f32.mxu1 %vm793_vm0, %v792_v0  ;;  %v150_v59 = vsub.s32 2, %v141_v38 }
  0x7a   :  { %354 = vmatprep.subr.mxu0 %v301_v60  ;;  %595 = vmatpush3.msra.mxu1 %v429_v20 }
  0x7b   :  { %355 = vmatpush1.msra.mxu0 %v300_v61  ;;  %596 = vmatprep.subr.mxu1 %v792_v0  ;;  %v151_v60 = vrot.slane %v138_v40, %v150_v59 }
  0x7c   :  { %356 = vmatprep.subr.mxu0 %v299_v62  ;;  %597 = vmatpush3.msra.mxu1 %v428_v21 }
  0x7d   :  { %357 = vmatpush1.msra.mxu0 %v298_v63  ;;  %598 = vmatprep.subr.mxu1 %v792_v0 }
  0x7e   :  { %358 = vmatprep.subr.mxu0 %v297_v1  ;;  %599 = vmatpush3.msra.mxu1 %v427_v22 }
  0x7f   :  { %359 = vmatpush1.msra.mxu0 %v296_v2  ;;  %600 = vmatprep.subr.mxu1 %v792_v0 }
  0x80   :  { %393 = vmatmul.mubr.f32.vlgmr.msra.gmra.mxu0 %v851_v3  ;;  %601 = vmatpush3.msra.mxu1 %v426_v23 }
  0x81   :  { %602 = vmatprep.subr.mxu1 %v792_v0 }
  0x82   :  { %603 = vmatpush3.msra.mxu1 %v425_v24 }
  0x83   :  { %604 = vmatprep.subr.mxu1 %v792_v0 }
  0x84   :  { %605 = vmatpush3.msra.mxu1 %v424_v25 }
  0x85   :  { %606 = vmatprep.subr.mxu1 %v792_v0 }
  0x86   :  { %607 = vmatpush3.msra.mxu1 %v423_v26 }
  0x87   :  { %608 = vmatprep.subr.mxu1 %v792_v0 }
  0x88   :  { %609 = vmatpush3.msra.mxu1 %v422_v27 }
  0x89   :  { %610 = vmatprep.subr.mxu1 %v792_v0 }
  0x8a   :  { %611 = vmatpush3.msra.mxu1 %v421_v28 }
  0x8b   :  { %612 = vmatprep.subr.mxu1 %v792_v0 }
  0x8c   :  { %613 = vmatpush3.msra.mxu1 %v420_v29 }
  0x8d   :  { %614 = vmatprep.subr.mxu1 %v792_v0 }
  0x8e   :  { %615 = vmatpush3.msra.mxu1 %v419_v30 }
  0x8f   :  { %616 = vmatprep.subr.mxu1 %v792_v0 }
  0x90   :  { %617 = vmatpush3.msra.mxu1 %v418_v31 }
  0x91   :  { %618 = vmatprep.subr.mxu1 %v792_v0 }
  0x92   :  { %619 = vmatpush3.msra.mxu1 %v417_v32 }
  0x93   :  { %620 = vmatprep.subr.mxu1 %v792_v0 }
  0x94   :  { %621 = vmatpush3.msra.mxu1 %v416_v34 }
  0x95   :  { %622 = vmatprep.subr.mxu1 %v792_v0 }
  0x96   :  { %623 = vmatpush3.msra.mxu1 %v415_v35 }
  0x97   :  { %624 = vmatprep.subr.mxu1 %v792_v0 }
  0x98   :  { %625 = vmatpush3.msra.mxu1 %v414_v36 }
 0x120   :  { %v221_v41 = vpop.f32.mrf.mxu0 }
 0x121   :  { %v222_v44 = vadd.f32 %v221_v41, %v143_v42 }
 0x122   :  { %v223_v43 = vpop.f32.mrf.mxu0 }
 0x123   :  { %v224_v56 = vadd.f32 %v223_v43, %v147_v54 }
 0x137   :  { %v292_v51 = vpop.f32.mrf.mxu1 }
 0x138   :  { %v293_v62 = vadd.f32 %v292_v51, %v151_v60 }
 0x139   :  { %v593_v52 = vpop.f32.mrf.mxu1 }
 0x140   :  { %v394_v45 = vpop.f32.mrf.mxu0 }
 0x141   :  { %v399_v46 = vadd.f32 %v394_v45, %v222_v44 }
 0x142   :  { %v396_v55 = vpop.f32.mrf.mxu0 }
 0x143   :  { %v523_v47 = vmul.f32 -1.442695, %v399_v46  ;;  %v406_v57 = vadd.f32 %v396_v55, %v224_v56 }
 0x145   :  { %643 = vpow2.f32 %v523_v47  ;;  %v524_v58 = vmul.f32 -1.442695, %v406_v57 }
 0x152   :  { %v644_v48 = vpop.eup %643 }
 0x153   :  { %v403_v49 = vadd.f32 1.0, %v644_v48 }
 0x155   :  { %645 = vrcp.f32 %v403_v49 }
 0x156   :  { %647 = vpow2.f32 %v524_v58 }
 0x162   :  { %v646_v0 = vpop.eup %645 }
 0x163   :  { %v413_v50 = vmul.f32 %v646_v0, %v851_v3  ;;  %v648_v61 = vpop.eup %647 }
 0x164   :  { %v410_v1 = vadd.f32 1.0, %v648_v61 }
 0x165   :  { %627 = vmatmul.mubr.f32.vlgmr.msra.gmra.mxu1 %v413_v50 }
 0x225   :  { %v496_v63 = vpop.f32.mrf.mxu1 }
 0x226   :  { %v500_v2 = vadd.f32 %v496_v63, %v293_v62 }
 0x227   :  { %v628_v4 = vpop.f32.mrf.mxu1 }
 0x228   :  { %649 = vtanh.f32 %v500_v2 }
 0x229   :  { %651 = vrcp.f32 %v410_v1 }
 0x235   :  { %v650_v3 = vpop.eup %649 }
 0x236   :  { %v502_v5 = vsub.f32 %v650_v3, %v847_v33  ;;  %v652_v6 = vpop.eup %651 }
 0x238   :  { %v503_v7 = vmul.f32 %v652_v6, %v502_v5 }
 0x23a   :  { %v504_v8 = vadd.f32 %v503_v7, %v847_v33 }
 0x23c   :  { %505 = vst [vmem:[#allocation11] sm:$0xff] %v504_v8 }
 0x23d   :  { %764 = shalt.err (!%p761_p1)
}
 0x23e   :  { %515 = dma.vmem_to_hbm [thread:$0]  %s513_s25, 128, %s903_s6, [#allocation4]  }
 0x23f   :  { %779 = dma.done.wait [#allocation4], 128  }
 0x240   :  { %780 = vsyncadd [#allocation4], 4294967168 }
 0x241   :  { %519 = vsyncpa [#allocation3], 1 }
 0x242   :  { %520 = vsyncpa [#allocation6], 1 }
 0x243   :  { %521 = vsyncpa [#allocation9], 1 }
 0x244   :  { %522 = vsyncpa [#allocation4], 1 }

</bundles_post_ra>
